<compile_context>
chip_gen: v7x
topology: tpu7x:2x2x1
jax: 0.10.0
libtpu: 0.0.40
codegen_flags: <defaults>
</compile_context>

<pallas_src>
import functools

import jax
import jax.numpy as jnp
from jax.experimental import pallas as pl
from jax.experimental.pallas import tpu as pltpu


# ---------------------------------------------------------------------------
# Kernel: transposed ("batch on lanes") fused MLP + log-softmax.
#   x_ref  : [TB, D_in]   (batch tile, rows)
#   w1_ref : [Hp, D_in]   (PyTorch fc1.weight, hidden zero-padded to Hp)
#   b1_ref : [Hp, 1]
#   w2_ref : [C,  Hp]     (PyTorch fc2.weight, hidden zero-padded)
#   b2_ref : [C,  1]
#   o_ref  : [C,  TB]     (log-probs, transposed -> lane-dense store)
# ---------------------------------------------------------------------------
def _classifier_kernel(x_ref, w1_ref, b1_ref, w2_ref, b2_ref, o_ref):
    x = x_ref[...]
    w1 = w1_ref[...]
    if x.dtype != w1.dtype:
        x = x.astype(w1.dtype)          # only the activation cast lives in-kernel

    # One small in-kernel transpose ([TB, D_in] -> [D_in, TB]) on the XLU slot;
    # everything downstream (bias, relu, softmax, store) is lane-dense.
    xt = x.T                                                        # [D_in, TB]

    # fc1 + ReLU, f32 accumulation on the MXU, f32 elementwise on the VPU.
    h = jnp.dot(w1, xt, preferred_element_type=jnp.float32)         # [Hp, TB]
    h = jnp.maximum(h + b1_ref[...], 0.0)

    w2 = w2_ref[...]
    if w2.dtype != h.dtype:
        h = h.astype(w2.dtype)
    logits = jnp.dot(w2, h, preferred_element_type=jnp.float32) + b2_ref[...]  # [C, TB]

    num_classes = logits.shape[0]
    if num_classes == 2:
        # log_softmax specialization for C == 2:
        #   d = l1 - l0 ;  out0 = -softplus(d) ;  out1 = d - softplus(d)
        # Stable softplus(d) = max(d, 0) + log(1 + exp(-|d|)); one exp + one log
        # on lane-dense [1, TB] data (EUP slot, nearly free).
        d = logits[1:2, :] - logits[0:1, :]                          # [1, TB]
        sp = jnp.maximum(d, 0.0) + jnp.log(1.0 + jnp.exp(-jnp.abs(d)))
        o_ref[0:1, :] = (-sp).astype(o_ref.dtype)
        o_ref[1:2, :] = (d - sp).astype(o_ref.dtype)
    else:
        # Generic path (still lane-dense: reductions run over the sublane/class axis).
        m = jnp.max(logits, axis=0, keepdims=True)
        lse = m + jnp.log(jnp.sum(jnp.exp(logits - m), axis=0, keepdims=True))
        o_ref[...] = (logits - lse).astype(o_ref.dtype)


# ---------------------------------------------------------------------------
# One-time parameter preparation (NOT in the per-call path).
# ---------------------------------------------------------------------------
def prepare_params(w1, b1, w2, b2, *, param_dtype=jnp.float32):
    """PyTorch Linear layout in: w1 [H, D_in], b1 [H], w2 [C, H], b2 [C].

    Out: w1_p [Hp, D_in], b1_col [Hp, 1], w2_p [C, Hp], b2_col [C, 1] with the
    hidden dim zero-padded to a multiple of 128 (numerically exact: zero rows
    of w1_p give relu(0)=0 which meets zero columns of w2_p).  Weights may be
    pre-cast once to bf16 via param_dtype (review item #6); biases stay f32
    (they are added to f32 MXU accumulations).
    """
    w1 = jnp.asarray(w1, jnp.float32)
    b1 = jnp.asarray(b1, jnp.float32)
    w2 = jnp.asarray(w2, jnp.float32)
    b2 = jnp.asarray(b2, jnp.float32)
    H, D_in = w1.shape
    C = w2.shape[0]
    Hp = ((H + 127) // 128) * 128

    w1_p = jnp.zeros((Hp, D_in), jnp.float32).at[:H, :].set(w1).astype(param_dtype)
    b1_col = jnp.zeros((Hp, 1), jnp.float32).at[:H, 0].set(b1)
    w2_p = jnp.zeros((C, Hp), jnp.float32).at[:, :H].set(w2).astype(param_dtype)
    b2_col = b2.reshape(C, 1)
    return w1_p, b1_col, w2_p, b2_col


# ---------------------------------------------------------------------------
# Batch-tile selection (review items #1 and #2).
# ---------------------------------------------------------------------------
_MIN_TB = 1024       # amortize ~0.35-0.6 us per-grid-step overhead (>= 80 KB of x / tile)
_MAX_TB = 8192       # ~640 KB of x + a few MB of hidden acts per tile: fits every gen's VMEM
_TARGET_STEPS = 8    # at large B keep >= 8 grid steps so v7x's 2 TensorCores both get work


def _pick_tb(B, batch_block):
    if batch_block is not None:
        tb = ((int(batch_block) + 127) // 128) * 128   # output block must be lane-aligned
        return max(128, tb)
    tb = ((pl.cdiv(B, _TARGET_STEPS) + 127) // 128) * 128
    return max(_MIN_TB, min(_MAX_TB, tb))


# ---------------------------------------------------------------------------
# Forward wrapper.
# ---------------------------------------------------------------------------
@functools.partial(jax.jit, static_argnames=("batch_block",))
def simple_classifier_forward(x, w1_p, b1_col, w2_p, b2_col, *, batch_block=None):
    """x: [B, D_in] (f32 or bf16 — no wrapper cast).  Params from prepare_params().
    Returns [B, C] f32 log-probabilities (log_softmax over the last axis)."""
    B, D_in = x.shape
    Hp = w1_p.shape[0]
    C = w2_p.shape[0]

    cost = pl.CostEstimate(
        flops=2 * B * (D_in * Hp + Hp * C),
        transcendentals=2 * B,
        bytes_accessed=(x.size * x.dtype.itemsize
                        + w1_p.size * w1_p.dtype.itemsize
                        + w2_p.size * w2_p.dtype.itemsize
                        + 4 * (Hp + C)
                        + 4 * B * C),
    )

    tb = _pick_tb(B, batch_block)

    if B <= tb:
        # Small batch: single invocation, whole arrays resident in VMEM.
        vmem = pl.BlockSpec(memory_space=pltpu.MemorySpace.VMEM)
        out_t = pl.pallas_call(
            _classifier_kernel,
            out_shape=jax.ShapeDtypeStruct((C, B), jnp.float32),
            in_specs=[vmem, vmem, vmem, vmem, vmem],
            out_specs=vmem,
            cost_estimate=cost,
        )(x, w1_p, b1_col, w2_p, b2_col)
    else:
        # Large batch: pipeline x / out over a batch grid; weights stay VMEM-resident
        # (constant block index => no re-fetch).  No pad / slice: grid = cdiv(B, tb)
        # and Pallas masks the ragged last block (review item #3).
        nsteps = pl.cdiv(B, tb)
        out_t = pl.pallas_call(
            _classifier_kernel,
            out_shape=jax.ShapeDtypeStruct((C, B), jnp.float32),
            grid_spec=pltpu.PrefetchScalarGridSpec(
                num_scalar_prefetch=0,
                grid=(nsteps,),
                in_specs=[
                    # If a profile ever shows exposed x DMA, add
                    #   pipeline_mode=pl.Buffered(3)
                    # to this BlockSpec (per-tile footprint is tiny).
                    pl.BlockSpec((tb, D_in), lambda i: (i, 0)),
                    pl.BlockSpec((Hp, D_in), lambda i: (0, 0)),
                    pl.BlockSpec((Hp, 1), lambda i: (0, 0)),
                    pl.BlockSpec((C, Hp), lambda i: (0, 0)),
                    pl.BlockSpec((C, 1), lambda i: (0, 0)),
                ],
                out_specs=pl.BlockSpec((C, tb), lambda i: (0, i)),
            ),
            compiler_params=pltpu.CompilerParams(
                dimension_semantics=("parallel",),  # megacore / v7x 2-TC sharding
            ),
            cost_estimate=cost,
        )(x, w1_p, b1_col, w2_p, b2_col)

    # Tiny layout fix-up back to the module's [B, C] convention
    # (8 B/row of output vs. 80 B/row of x traffic).
    return out_t.T


if __name__ == "__main__":
    # Module config: 20-dimensional inputs, hidden=100, output=2.
    B, D_in, H, C = 8, 20, 100, 2

    key = jax.random.PRNGKey(0)
    kx, k1, k2, k3, k4, kb = jax.random.split(key, 6)

    # Deterministic PyTorch-Linear-style init: U(-1/sqrt(fan_in), 1/sqrt(fan_in)).
    bound1 = 1.0 / (D_in ** 0.5)
    bound2 = 1.0 / (H ** 0.5)
    x = jax.random.normal(kx, (B, D_in), dtype=jnp.float32)
    w1 = jax.random.uniform(k1, (H, D_in), jnp.float32, -bound1, bound1)
    b1 = jax.random.uniform(k2, (H,), jnp.float32, -bound1, bound1)
    w2 = jax.random.uniform(k3, (C, H), jnp.float32, -bound2, bound2)
    b2 = jax.random.uniform(k4, (C,), jnp.float32, -bound2, bound2)

    # One-time parameter preparation (pad H 100 -> 128, reshape biases).
    params = prepare_params(w1, b1, w2, b2)

    def ref(xa):
        h = jnp.maximum(xa.astype(jnp.float32) @ w1.T + b1, 0.0)
        return jax.nn.log_softmax(h @ w2.T + b2, axis=-1)

    # Small-batch (grid=()) path.
    y = simple_classifier_forward(x, *params)
    jax.block_until_ready(y)
    assert y.shape == (B, C)
    assert jnp.allclose(y, ref(x), atol=1e-5), "small-batch mismatch vs reference"

    # Batch-gridded path with a ragged last block (400 = 3*128 + 16 rows).
    xb = jax.random.normal(kb, (400, D_in), jnp.float32)
    yb = simple_classifier_forward(xb, *params, batch_block=128)
    jax.block_until_ready(yb)
    assert yb.shape == (400, C)
    assert jnp.allclose(yb, ref(xb), atol=1e-5), "gridded-batch mismatch vs reference"

    # bf16 activations + bf16 weights (pre-cast once), f32 accumulation / softmax.
    params_bf16 = prepare_params(w1, b1, w2, b2, param_dtype=jnp.bfloat16)
    yb16 = simple_classifier_forward(xb.astype(jnp.bfloat16), *params_bf16,
                                     batch_block=128)
    jax.block_until_ready(yb16)
    assert jnp.allclose(yb16, ref(xb), atol=5e-2), "bf16 path mismatch vs reference"

    print("KERNEL_OK")
</pallas_src>

<mosaic_0001>
module attributes {stable_mosaic.version = 11 : i64} {
  func.func @_classifier_kernel(%arg0: memref<8x20xf32, #tpu.memory_space<vmem>>, %arg1: memref<128x20xf32, #tpu.memory_space<vmem>>, %arg2: memref<128x1xf32, #tpu.memory_space<vmem>>, %arg3: memref<2x128xf32, #tpu.memory_space<vmem>>, %arg4: memref<2x1xf32, #tpu.memory_space<vmem>>, %arg5: memref<2x8xf32, #tpu.memory_space<vmem>>) attributes {dimension_semantics = [], scalar_prefetch = 0 : i64, scratch_operands = 0 : i64, tpu.core_type = #tpu.core_type<tc>} {
    %c0 = arith.constant 0 : index
    %c0_0 = arith.constant 0 : index
    %0 = vector.load %arg0[%c0, %c0_0] : memref<8x20xf32, #tpu.memory_space<vmem>>, vector<8x20xf32>
    %c0_1 = arith.constant 0 : index
    %c0_2 = arith.constant 0 : index
    %1 = vector.load %arg1[%c0_1, %c0_2] : memref<128x20xf32, #tpu.memory_space<vmem>>, vector<128x20xf32>
    %2 = tpu.transpose %0, [1, 0] : vector<8x20xf32> -> vector<20x8xf32>
    %cst = arith.constant dense<0.000000e+00> : vector<128x8xf32>
    %3 = tpu.matmul %1, %2, %cst {dimension_numbers = #tpu.dot_dimension_numbers<[1], [0], [0], [1], [0, 0, 1, 1], [], []>} : vector<128x20xf32>, vector<20x8xf32>, vector<128x8xf32> -> vector<128x8xf32>
    %c0_3 = arith.constant 0 : index
    %c0_4 = arith.constant 0 : index
    %4 = vector.load %arg2[%c0_3, %c0_4] : memref<128x1xf32, #tpu.memory_space<vmem>>, vector<128x1xf32>
    %5 = vector.broadcast %4 : vector<128x1xf32> to vector<128x8xf32>
    %6 = arith.addf %3, %5 : vector<128x8xf32>
    %cst_5 = arith.constant 0.000000e+00 : f32
    %7 = vector.broadcast %cst_5 : f32 to vector<128x8xf32>
    %8 = arith.maximumf %6, %7 : vector<128x8xf32>
    %c0_6 = arith.constant 0 : index
    %c0_7 = arith.constant 0 : index
    %9 = vector.load %arg3[%c0_6, %c0_7] : memref<2x128xf32, #tpu.memory_space<vmem>>, vector<2x128xf32>
    %cst_8 = arith.constant dense<0.000000e+00> : vector<2x8xf32>
    %10 = tpu.matmul %9, %8, %cst_8 {dimension_numbers = #tpu.dot_dimension_numbers<[1], [0], [0], [1], [0, 0, 1, 1], [], []>} : vector<2x128xf32>, vector<128x8xf32>, vector<2x8xf32> -> vector<2x8xf32>
    %c0_9 = arith.constant 0 : index
    %c0_10 = arith.constant 0 : index
    %11 = vector.load %arg4[%c0_9, %c0_10] : memref<2x1xf32, #tpu.memory_space<vmem>>, vector<2x1xf32>
    %12 = vector.broadcast %11 : vector<2x1xf32> to vector<2x8xf32>
    %13 = arith.addf %10, %12 : vector<2x8xf32>
    %14 = vector.extract_strided_slice %13 {offsets = [1, 0], sizes = [1, 8], strides = [1, 1]} : vector<2x8xf32> to vector<1x8xf32>
    %15 = vector.extract_strided_slice %13 {offsets = [0, 0], sizes = [1, 8], strides = [1, 1]} : vector<2x8xf32> to vector<1x8xf32>
    %16 = arith.subf %14, %15 : vector<1x8xf32>
    %cst_11 = arith.constant 0.000000e+00 : f32
    %17 = vector.broadcast %cst_11 : f32 to vector<1x8xf32>
    %18 = arith.maximumf %16, %17 : vector<1x8xf32>
    %19 = math.absf %16 : vector<1x8xf32>
    %cst_12 = arith.constant 0.000000e+00 : f32
    %20 = vector.broadcast %cst_12 : f32 to vector<1x8xf32>
    %21 = arith.subf %20, %19 : vector<1x8xf32>
    %22 = math.exp %21 : vector<1x8xf32>
    %cst_13 = arith.constant 1.000000e+00 : f32
    %23 = vector.broadcast %cst_13 : f32 to vector<1x8xf32>
    %24 = arith.addf %23, %22 : vector<1x8xf32>
    %25 = math.log %24 : vector<1x8xf32>
    %26 = arith.addf %18, %25 : vector<1x8xf32>
    %cst_14 = arith.constant 0.000000e+00 : f32
    %27 = vector.broadcast %cst_14 : f32 to vector<1x8xf32>
    %28 = arith.subf %27, %26 : vector<1x8xf32>
    %c0_15 = arith.constant 0 : index
    %c0_16 = arith.constant 0 : index
    %29 = vector.load %arg5[%c0_15, %c0_16] : memref<2x8xf32, #tpu.memory_space<vmem>>, vector<1x8xf32>
    tpu.vector_store %arg5[%c0_15, %c0_16], %28 {strides = array<i32>} : memref<2x8xf32, #tpu.memory_space<vmem>>, vector<1x8xf32>,
    %30 = arith.subf %16, %26 : vector<1x8xf32>
    %c1 = arith.constant 1 : index
    %c0_17 = arith.constant 0 : index
    %31 = vector.load %arg5[%c1, %c0_17] : memref<2x8xf32, #tpu.memory_space<vmem>>, vector<1x8xf32>
    tpu.vector_store %arg5[%c1, %c0_17], %30 {strides = array<i32>} : memref<2x8xf32, #tpu.memory_space<vmem>>, vector<1x8xf32>,
    return
  }
}

</mosaic_0001>

<bundles_post_ra>
// kernel: simple_classifier_forward.1
= control target key start
LH: loop header
LB: loop body
LE: loop exit
PB: predicated region body
PF: predicated region fallthrough
CT: control target
= control target key end

     0   :  { %vm134_vm0 = vcmask 162816   ;;  %v627_v3 = vmov 0   ;;  %s805_s0 = inlined_call_operand.vmem [shape: f32[8,20], index: 0, kind: input, shape index: {}]   ;;  %s806_s1 = inlined_call_operand.vmem [shape: f32[128,20], index: 1, kind: input, shape index: {}]   ;;  %s807_s2 = inlined_call_operand.vmem [shape: f32[128,1], index: 2, kind: input, shape index: {}]   ;;  %s808_s3 = inlined_call_operand.vmem [shape: f32[2,128], index: 3, kind: input, shape index: {}]   ;;  %s809_s4 = inlined_call_operand.vmem [shape: f32[2,1], index: 4, kind: input, shape index: {}]   ;;  %s810_s5 = inlined_call_operand.hbm [shape: f32[2,8], index: 5, kind: output, shape index: {}]  }
   0x1   :  { %v21_v0 = vld [vmem:[%s805_s0] sm:$0xff]  ;;  %v23_v2 = vld [vmem:[%s806_s1 + $0x8] sm:$0xff]  ;;  %597 = vset.pattern.permute.xlu0 %v627_v3  ;;  %v24_v4 = vld [vmem:[%s806_s1 + $0x10] sm:$0xff]  ;;  %598 = vset.pattern.permute.xlu1 %v627_v3 }
   0x2   :  { %v22_v1 = vld [vmem:[%s806_s1] sm:$0xff]  ;;  %507 = vmatprep.subr.msk.mxu0 %vm134_vm0, %v21_v0  ;;  %v25_v6 = vld [vmem:[%s806_s1 + $0x18] sm:$0xff]  ;;  %v40_v7 = vld [vmem:[%s807_s2 + $0x10] sm:$0xff] }
   0x3   :  { %509 = vmatprep.mubr.msk.f32.mxu0 %vm134_vm0, %v22_v1  ;;  %508 = vmatpush3.xpose.msk.msra.mxu0 %vm134_vm0, %v21_v0  ;;  %v38_v5 = vld [vmem:[%s807_s2] sm:$0xff]  ;;  %v39_v9 = vld [vmem:[%s807_s2 + $0x8] sm:$0xff]  ;;  %v41_v10 = vld [vmem:[%s807_s2 + $0x18] sm:$0xff] }
   0x4   :  { %56 = vperm.xlu0 %597, %v38_v5   ;;  %v26_v8 = vld [vmem:[%s806_s1 + $0x20] sm:$0xff]  ;;  %66 = vperm.xlu1 %598, %v40_v7   ;;  %v27_v11 = vld [vmem:[%s806_s1 + $0x28] sm:$0xff]  ;;  %v28_v12 = vld [vmem:[%s806_s1 + $0x30] sm:$0xff] }
   0x5   :  { %v42_v13 = vld [vmem:[%s807_s2 + $0x20] sm:$0xff] }
   0x6   :  { %510 = vmatmul.mubr.msk.f32.vlgmr.msra.gmra.mrb[0].mxu0 %vm134_vm0, %v23_v2 }
   0x7   :  { %512 = vmatprep.mubr.msk.f32.mxu0 %vm134_vm0, %v24_v4 }
   0x8   :  { %61 = vperm.xlu0 %597, %v39_v9   ;;  %71 = vperm.xlu1 %598, %v41_v10  }
   0xa   :  { %513 = vmatmul.mubr.msk.f32.gmra.mrb[2].mxu0 %vm134_vm0, %v25_v6 }
   0xb   :  { %515 = vmatprep.mubr.msk.f32.mxu0 %vm134_vm0, %v26_v8 }
   0xc   :  { %10 = vsyncpa [#allocation3], 0  ;;  %v43_v14 = vld [vmem:[%s807_s2 + $0x28] sm:$0xff]  ;;  %v29_v15 = vld [vmem:[%s806_s1 + $0x38] sm:$0xff]  ;;  %76 = vperm.xlu0 %597, %v42_v13   ;;  %v628_v35 = vmov 0.0|0.0   ;;  %vm629_vm1 = vmmov 0  }
   0xd   :  { %v30_v16 = vld [vmem:[%s806_s1 + $0x40] sm:$0xff]  ;;  %v44_v17 = vld [vmem:[%s807_s2 + $0x30] sm:$0xff]  ;;  %81 = vperm.xlu1 %598, %v43_v14   ;;  %v45_v18 = vld [vmem:[%s807_s2 + $0x38] sm:$0xff]  ;;  %568 = vmatprep.subr.bf16.mxu1 %v628_v35  ;;  %v630_v36 = vmov 0.0   ;;  %vm438_vm2 = vcmask 58369  }
   0xe   :  { %516 = vmatmul.mubr.msk.f32.gmra.mrb[4].mxu0 %vm134_vm0, %v27_v11  ;;  %v31_v19 = vld [vmem:[%s806_s1 + $0x48] sm:$0xff]  ;;  %v32_v20 = vld [vmem:[%s806_s1 + $0x50] sm:$0xff]  ;;  %v46_v21 = vld [vmem:[%s807_s2 + $0x40] sm:$0xff]  ;;  %565 = vmatprep.mubr.msk.f32.mxu1 %vm629_vm1, %v630_v36 }
   0xf   :  { %518 = vmatprep.mubr.msk.f32.mxu0 %vm134_vm0, %v28_v12  ;;  %v47_v22 = vld [vmem:[%s807_s2 + $0x48] sm:$0xff]  ;;  %v33_v23 = vld [vmem:[%s806_s1 + $0x58] sm:$0xff]  ;;  %v34_v24 = vld [vmem:[%s806_s1 + $0x60] sm:$0xff] }
  0x10   :  { %86 = vperm.xlu0 %597, %v44_v17   ;;  %v48_v25 = vld [vmem:[%s807_s2 + $0x50] sm:$0xff]  ;;  %v49_v26 = vld [vmem:[%s807_s2 + $0x58] sm:$0xff]  ;;  %v35_v27 = vld [vmem:[%s806_s1 + $0x68] sm:$0xff] }
  0x11   :  { %91 = vperm.xlu1 %598, %v45_v18   ;;  %v36_v28 = vld [vmem:[%s806_s1 + $0x70] sm:$0xff]  ;;  %v50_v29 = vld [vmem:[%s807_s2 + $0x60] sm:$0xff]  ;;  %v51_v30 = vld [vmem:[%s807_s2 + $0x68] sm:$0xff] }
  0x12   :  { %519 = vmatmul.mubr.msk.f32.gmra.mrb[6].mxu0 %vm134_vm0, %v29_v15  ;;  %v37_v31 = vld [vmem:[%s806_s1 + $0x78] sm:$0xff]  ;;  %v52_v32 = vld [vmem:[%s807_s2 + $0x70] sm:$0xff]  ;;  %v348_v34 = vld [vmem:[%s809_s4] sm:$0x3]  ;;  %s631_s4 = smov [#allocation2]  }
  0x13   :  { %521 = vmatprep.mubr.msk.f32.mxu0 %vm134_vm0, %v30_v16  ;;  %v53_v33 = vld [vmem:[%s807_s2 + $0x78] sm:$0xff]  ;;  %s448_s8 = sshll.u32 %s631_s4, 4  ;;  %s449_s8 = int_to_ptr.vmem [resolvable:$true] %s448_s8 }
  0x14   :  { %96 = vperm.xlu0 %597, %v46_v21   ;;  %p608_p1 = scmp.lt.s32.totalorder %s449_s8, %s449_s8 }
  0x15   :  { %101 = vperm.xlu1 %598, %v47_v22  }
  0x16   :  { %522 = vmatmul.mubr.msk.f32.gmra.mrb[8].mxu0 %vm134_vm0, %v31_v19 }
  0x17   :  { %524 = vmatprep.mubr.msk.f32.mxu0 %vm134_vm0, %v32_v20 }
  0x18   :  { %106 = vperm.xlu0 %597, %v48_v25  }
  0x19   :  { %111 = vperm.xlu1 %598, %v49_v26  }
  0x1a   :  { %525 = vmatmul.mubr.msk.f32.gmra.mrb[10].mxu0 %vm134_vm0, %v33_v23 }
  0x1b   :  { %527 = vmatprep.mubr.msk.f32.mxu0 %vm134_vm0, %v34_v24 }
  0x1c   :  { %116 = vperm.xlu0 %597, %v50_v29  }
  0x1d   :  { %121 = vperm.xlu1 %598, %v51_v30  }
  0x1e   :  { %528 = vmatmul.mubr.msk.f32.gmra.mrb[12].mxu0 %vm134_vm0, %v35_v27 }
  0x1f   :  { %530 = vmatprep.mubr.msk.f32.mxu0 %vm134_vm0, %v36_v28 }
  0x20   :  { %126 = vperm.xlu0 %597, %v52_v32  }
  0x21   :  { %131 = vperm.xlu1 %598, %v53_v33  }
  0x22   :  { %531 = vmatmul.mubr.msk.f32.gmra.mrb[14].mxu0 %vm134_vm0, %v37_v31 }
  0x24   :  { %351 = vperm.xlu0 %597, %v348_v34  }
  0x83   :  { %v67_v37 = vpop.permute.xlu1 %66  ;;  %v57_v38 = vpop.permute.xlu0 %56 }
  0x87   :  { %v72_v39 = vpop.permute.xlu1 %71  ;;  %v62_v40 = vpop.permute.xlu0 %61 }
  0x8b   :  { %v77_v42 = vpop.permute.xlu0 %76 }
  0x8c   :  { %v82_v41 = vpop.permute.xlu1 %81 }
  0x8f   :  { %v87_v51 = vpop.permute.xlu0 %86 }
  0x90   :  { %v92_v48 = vpop.permute.xlu1 %91 }
  0x93   :  { %v97_v0 = vpop.permute.xlu0 %96 }
  0x94   :  { %v102_v61 = vpop.permute.xlu1 %101 }
  0x97   :  { %v107_v12 = vpop.permute.xlu0 %106 }
  0x98   :  { %v112_v9 = vpop.permute.xlu1 %111 }
  0x9b   :  { %v117_v25 = vpop.permute.xlu0 %116 }
  0x9c   :  { %v122_v22 = vpop.permute.xlu1 %121 }
  0xa0   :  { %v132_v34 = vpop.permute.xlu1 %131 }
  0xd9   :  { %v511_v43 = vpop.f32.mrb[0].mxu0 }
  0xda   :  { %v258_v44 = vadd.f32 %v511_v43, %v62_v40  ;;  %v252_v45 = vpop.f32.mrb[1].mxu0 }
  0xdb   :  { %v253_v46 = vadd.f32 %v252_v45, %v57_v38  ;;  %v127_v38 = vpop.permute.xlu0 %126 }
  0xdc   :  { %v332_v47 = vmax.f32 %v258_v44, 0.0 }
  0xdd   :  { %v331_v49 = vmax.f32 %v253_v46, 0.0  ;;  %v514_v50 = vpop.f32.mrb[2].mxu0  ;;  %v347_v46 = vld [vmem:[%s808_s3] sm:$0x3]  ;;  %s603_s3 = scalar_lea.vmem %s449_s8, 32 }
  0xde   :  { %v268_v52 = vadd.f32 %v514_v50, %v72_v39  ;;  %v262_v53 = vpop.f32.mrb[3].mxu0  ;;  %p604_p0 = scmp.ne.s32.totalorder %s449_s8, %s603_s3  ;;  %p609_p2 = scmp.lt.s32.totalorder %s603_s3, %s603_s3 }
  0xdf   :  { %v263_v54 = vadd.f32 %v262_v53, %v67_v37  ;;  %v569_v55 = vpack.c.bf16 %v332_v47, %v331_v49  ;;  %v352_v47 = vpop.permute.xlu0 %351 }
  0xe0   :  { %v334_v56 = vmax.f32 %v268_v52, 0.0  ;;  %p610_p3 = por %p609_p2, %p608_p1 }
  0xe1   :  { %v333_v57 = vmax.f32 %v263_v54, 0.0  ;;  %v517_v58 = vpop.f32.mrb[4].mxu0  ;;  %570 = vmatpush3.bf16.msra.mxu1 %v569_v55 }
  0xe2   :  { %v278_v59 = vadd.f32 %v517_v58, %v82_v41  ;;  %v272_v60 = vpop.f32.mrb[5].mxu0  ;;  %571 = vmatprep.subr.bf16.mxu1 %v628_v35  ;;  %p611_p4 = pnand %p610_p3, %p604_p0 }
  0xe3   :  { %v572_v62 = vpack.c.bf16 %v334_v56, %v333_v57  ;;  %v273_v63 = vadd.f32 %v272_v60, %v77_v42 }
  0xe4   :  { %v336_v1 = vmax.f32 %v278_v59, 0.0 }
  0xe5   :  { %v335_v2 = vmax.f32 %v273_v63, 0.0  ;;  %v520_v3 = vpop.f32.mrb[6].mxu0  ;;  %573 = vmatpush3.bf16.msra.mxu1 %v572_v62 }
  0xe6   :  { %v288_v4 = vadd.f32 %v520_v3, %v92_v48  ;;  %v282_v5 = vpop.f32.mrb[7].mxu0  ;;  %574 = vmatprep.subr.bf16.mxu1 %v628_v35 }
  0xe7   :  { %v575_v6 = vpack.c.bf16 %v336_v1, %v335_v2  ;;  %v283_v7 = vadd.f32 %v282_v5, %v87_v51 }
  0xe8   :  { %v338_v8 = vmax.f32 %v288_v4, 0.0 }
  0xe9   :  { %v337_v10 = vmax.f32 %v283_v7, 0.0  ;;  %v523_v11 = vpop.f32.mrb[8].mxu0  ;;  %576 = vmatpush3.bf16.msra.mxu1 %v575_v6 }
  0xea   :  { %v298_v13 = vadd.f32 %v523_v11, %v102_v61  ;;  %v292_v14 = vpop.f32.mrb[9].mxu0  ;;  %577 = vmatprep.subr.bf16.mxu1 %v628_v35 }
  0xeb   :  { %v578_v15 = vpack.c.bf16 %v338_v8, %v337_v10  ;;  %v293_v16 = vadd.f32 %v292_v14, %v97_v0 }
  0xec   :  { %v340_v17 = vmax.f32 %v298_v13, 0.0 }
  0xed   :  { %v339_v18 = vmax.f32 %v293_v16, 0.0  ;;  %v526_v19 = vpop.f32.mrb[10].mxu0  ;;  %579 = vmatpush3.bf16.msra.mxu1 %v578_v15 }
  0xee   :  { %v308_v20 = vadd.f32 %v526_v19, %v112_v9  ;;  %v302_v21 = vpop.f32.mrb[11].mxu0  ;;  %580 = vmatprep.subr.bf16.mxu1 %v628_v35 }
  0xef   :  { %v581_v23 = vpack.c.bf16 %v340_v17, %v339_v18  ;;  %v303_v24 = vadd.f32 %v302_v21, %v107_v12 }
  0xf0   :  { %v342_v26 = vmax.f32 %v308_v20, 0.0 }
  0xf1   :  { %v341_v27 = vmax.f32 %v303_v24, 0.0  ;;  %v529_v28 = vpop.f32.mrb[12].mxu0  ;;  %582 = vmatpush3.bf16.msra.mxu1 %v581_v23 }
  0xf2   :  { %v318_v29 = vadd.f32 %v529_v28, %v122_v22  ;;  %v312_v30 = vpop.f32.mrb[13].mxu0  ;;  %583 = vmatprep.subr.bf16.mxu1 %v628_v35 }
  0xf3   :  { %v584_v31 = vpack.c.bf16 %v342_v26, %v341_v27  ;;  %v313_v32 = vadd.f32 %v312_v30, %v117_v25 }
  0xf4   :  { %v344_v33 = vmax.f32 %v318_v29, 0.0 }
  0xf5   :  { %v343_v36 = vmax.f32 %v313_v32, 0.0  ;;  %v532_v37 = vpop.f32.mrb[14].mxu0  ;;  %585 = vmatpush3.bf16.msra.mxu1 %v584_v31 }
  0xf6   :  { %v328_v39 = vadd.f32 %v532_v37, %v132_v34  ;;  %v322_v40 = vpop.f32.mrb[15].mxu0  ;;  %586 = vmatprep.subr.bf16.mxu1 %v628_v35 }
  0xf7   :  { %v587_v41 = vpack.c.bf16 %v344_v33, %v343_v36  ;;  %v323_v42 = vadd.f32 %v322_v40, %v127_v38 }
  0xf8   :  { %v346_v43 = vmax.f32 %v328_v39, 0.0 }
  0xf9   :  { %v345_v44 = vmax.f32 %v323_v42, 0.0  ;;  %588 = vmatpush3.bf16.msra.mxu1 %v587_v41 }
  0xfa   :  { %589 = vmatprep.subr.bf16.mxu1 %v628_v35 }
  0xfb   :  { %v590_v45 = vpack.c.bf16 %v346_v43, %v345_v44 }
  0xfd   :  { %591 = vmatpush3.bf16.msra.mxu1 %v590_v45 }
 0x100   :  { %566 = vmatmul.mubr.f32.vlgmr.msra.gmra.mrb[0].mxu1 %v347_v46 }
 0x1d3   :  { %v420_v48 = vpop.f32.mrb[0].mxu1 }
 0x1d4   :  { %v421_v49 = vadd.f32 %v420_v48, %v352_v47  ;;  %v567_v50 = vpop.f32.mrb[1].mxu1 }
 0x1d6   :  { %v425_v51 = vrot.slane %v421_v49, 7 }
 0x1d8   :  { %v427_v52 = vsub.f32 %v421_v49, %v425_v51 }
 0x1da   :  { %v429_v53 = vand.u32 2147483647, %v427_v52  ;;  %v428_v58 = vmax.f32 %v427_v52, 0.0 }
 0x1dc   :  { %v430_v54 = vsub.f32 0.0, %v429_v53 }
 0x1de   :  { %v431_v55 = vmul.f32 1.442695, %v430_v54 }
 0x1e0   :  { %599 = vpow2.f32 %v431_v55 }
 0x1ea   :  { %v600_v56 = vpop.eup %599 }
 0x1eb   :  { %v433_v57 = vadd.f32 1.0, %v600_v56 }
 0x1ed   :  { %601 = vlog2.f32 %v433_v57 }
 0x1f7   :  { %v602_v35 = vpop.eup %601 }
 0x1f8   :  { %v435_v59 = vmul.f32 0.6931472, %v602_v35 }
 0x1fa   :  { %v436_v60 = vadd.f32 %v435_v59, %v428_v58 }
 0x1fc   :  { %v437_v61 = vsub.f32 0.0, %v436_v60  ;;  %v440_v62 = vsub.f32 %v427_v52, %v436_v60 }
 0x1fe   :  { %439 = vst.msk [vmem:[#allocation2 - $0x1] sm:$0x2] %vm438_vm2, %v437_v61  ;;  %441 = vst.msk [vmem:[#allocation2] sm:$0x2] %vm438_vm2, %v440_v62 }
 0x1ff   :  { %614 = shalt.err (!%p611_p4)
}
 0x200   :  { %s615_s11 = scalar_lea.hbm %s810_s5, 32 }
 0x201   :  { %p616_p5 = scmp.ne.s32.totalorder %s810_s5, %s615_s11  ;;  %p619_p6 = scmp.lt.u32.totalorder %s615_s11, %s810_s5 }
 0x203   :  { %p621_p7 = pnand %p619_p6, %p616_p5 }
 0x205   :  { %624 = shalt.err (!%p621_p7)
}
 0x206   :  { %451 = dma.vmem_to_hbm [thread:$0]  %s449_s8, 32, %s810_s5, [#allocation3]  }
 0x207   :  { %625 = dma.done.wait [#allocation3], 32  }
 0x208   :  { %626 = vsyncadd [#allocation3], 4294967264 }
 0x209   :  { %455 = vsyncpa [#allocation3], 1 }

</bundles_post_ra>
